<compile_context>
chip_gen: v6e
topology: v6e:2x2x1
jax: 0.10.0
libtpu: 0.0.40
codegen_flags: <defaults>
</compile_context>

<pallas_src>
import math

import jax
import jax.numpy as jnp
from jax import lax
from jax.experimental import pallas as pl
from jax.experimental.pallas import tpu as pltpu


def _task_prompt_kernel(ids_ref, emb_t_ref, out_ref):
    # ids_ref  : SMEM (B,) int32           scalar-prefetched task ids
    # emb_t_ref: VMEM (C, T)               transposed embedding table (resident)
    # out_ref  : VMEM (b_tile, C, hw_tile) lane-dense output slab for this step
    b_tile, C, hw_tile = out_ref.shape
    T = emb_t_ref.shape[1]
    b0 = pl.program_id(0) * b_tile

    emb_t = emb_t_ref[...]                                   # (C, T): one load
    lane_iota = lax.broadcasted_iota(jnp.int32, (C, T), 1)   # hoisted out of loop

    def body(bl, carry):
        tid = ids_ref[b0 + bl]
        # One-hot column select via mask + lane reduce (exact: single nonzero
        # term).  T is tiny, so this is a few VPU ops + one XLU reduce per row.
        # TODO(synk): if T ever grows into the hundreds, switch to a dynamic
        # slice emb_t_ref[:, pl.ds(tid, 1)] so per-row work stays O(1) in T.
        sel = jnp.where(lane_iota == tid, emb_t, jnp.zeros_like(emb_t))
        col = jnp.sum(sel, axis=1, keepdims=True)            # (C, 1) sublane col
        # Lane splat to the spatial tile -> whole-vreg unmasked stores.
        out_ref[bl] = jnp.broadcast_to(col, (C, hw_tile)).astype(out_ref.dtype)
        return carry

    # Unroll small rows for scheduler visibility; keep big rows at unroll=1 —
    # the kernel is purely HBM-write-bound, so unrolling large broadcast slabs
    # only adds vreg pressure.
    row_bytes = C * hw_tile * jnp.dtype(out_ref.dtype).itemsize
    unroll = min(b_tile, 8) if row_bytes <= 32 * 1024 else 1
    lax.fori_loop(0, b_tile, body, None, unroll=unroll)


# Per-output-buffer block cap.  Double-buffered (2x) plus the tiny table this
# stays under every generation's scoped-VMEM default (v5e 16 MiB, v6e/v7x
# 32 MiB) and well under v7x's 64 MiB physical VMEM.
_BLOCK_CAP_BYTES = 6 * 1024 * 1024


def _largest_divisor_leq(n, cap):
    n = int(n)
    cap = max(1, min(int(cap), n))
    for d in range(cap, 0, -1):
        if n % d == 0:
            return d
    return 1


def task_prompt_forward(task_ids, embedding_table, size):
    """task_ids: int (B,), embedding_table: (T, C), size: (H, W).

    Returns (B, C, H, W) with embedding_table.dtype, equal to
    embedding_table[task_ids] broadcast over the spatial dims.
    """
    B = int(task_ids.shape[0])
    T, C = embedding_table.shape
    H, W = int(size[0]), int(size[1])
    HW = H * W
    dtype = embedding_table.dtype
    itemsize = jnp.dtype(dtype).itemsize

    # ---- spatial (lane) tiling: multiple-of-128 tiles that divide H*W ------
    if HW % 128 == 0:
        d_cap = _BLOCK_CAP_BYTES // max(1, C * 128 * itemsize)
        hw_tile = 128 * _largest_divisor_leq(HW // 128, max(1, d_cap))
    else:
        # TODO(synk): for H*W not a multiple of 128 (e.g. 7x7) stores are
        # masked vst.msk; pad H*W to 128 in-kernel if this shape matters.
        hw_tile = HW
    num_hw_tiles = HW // hw_tile

    # ---- batch tiling: a divisor of B -> no pad, no out[:B] copy -----------
    row_bytes = C * hw_tile * itemsize
    b_cap = _BLOCK_CAP_BYTES // max(1, row_bytes)
    b_tile = _largest_divisor_leq(B, max(1, b_cap))
    num_b_tiles = B // b_tile

    # ---- megacore: large outputs must span >= 2 grid steps (v7x has 2 TCs) --
    total_bytes = B * C * HW * itemsize
    if num_b_tiles * num_hw_tiles == 1 and total_bytes >= (1 << 20):
        if B % 2 == 0:
            b_tile = B // 2
            num_b_tiles = 2
        elif hw_tile % 256 == 0:
            hw_tile //= 2
            num_hw_tiles = HW // hw_tile
            row_bytes = C * hw_tile * itemsize

    ids = jnp.asarray(task_ids, dtype=jnp.int32)
    emb_t = embedding_table.T  # (C, T): tiny transpose outside the kernel

    grid_spec = pltpu.PrefetchScalarGridSpec(
        num_scalar_prefetch=1,
        grid=(num_b_tiles, num_hw_tiles),
        in_specs=[
            # Full table, constant block index -> fetched once, VMEM-resident.
            pl.BlockSpec((C, T), lambda i, j, ids: (0, 0)),
        ],
        out_specs=pl.BlockSpec(
            (b_tile, C, hw_tile), lambda i, j, ids: (i, 0, j)
        ),
    )

    block_bytes = b_tile * row_bytes
    table_bytes = C * T * itemsize
    vmem_limit = int(
        min(64 << 20, max(16 << 20, 2 * block_bytes + 2 * table_bytes + (8 << 20)))
    )

    out = pl.pallas_call(
        _task_prompt_kernel,
        out_shape=jax.ShapeDtypeStruct((B, C, HW), dtype),
        grid_spec=grid_spec,
        compiler_params=pltpu.CompilerParams(
            dimension_semantics=("parallel", "parallel"),
            vmem_limit_bytes=vmem_limit,
        ),
        cost_estimate=pl.CostEstimate(
            flops=0,
            transcendentals=0,
            bytes_accessed=int(total_bytes + table_bytes + 4 * B),
        ),
    )(ids, emb_t)

    # TODO(synk): if the downstream consumer can take the (B, C) rows and
    # broadcast lazily (or fuse the broadcast into its own kernel), skip
    # materializing the H*W copies entirely — cuts HBM traffic by H*W.
    return out.reshape(B, C, H, W)  # contiguous reshape: free


class TaskPrompt:
    """Mirror of the PyTorch module, with deterministic in-script init."""

    def __init__(self, task_list, channel, key):
        self.task_list = list(task_list)
        num_tasks = len(self.task_list)
        # nn.init.kaiming_normal_ on (num_tasks, channel):
        # fan_in = channel, gain = sqrt(2) -> std = sqrt(2 / channel)
        std = math.sqrt(2.0 / channel)
        self.weight = (
            jax.random.normal(key, (num_tasks, channel), dtype=jnp.float32) * std
        )

    def __call__(self, tasks, size):
        # TODO(synk): the string -> index lookup is host-side glue with no
        # device equivalent (same as the PyTorch module's list.index loop).
        ids = jnp.asarray(
            [self.task_list.index(t) for t in tasks], dtype=jnp.int32
        )
        return task_prompt_forward(ids, self.weight, size)


if __name__ == "__main__":
    key = jax.random.PRNGKey(0)

    task_list = ["segmentation", "depth", "normal", "edge"]
    channel = 8
    size = (16, 16)
    tasks = ["depth", "segmentation"]  # batch of 2

    module = TaskPrompt(task_list, channel, key)
    out = module(tasks, size)
    out = jax.block_until_ready(out)

    # reference check (plain JAX)
    ids = jnp.asarray([task_list.index(t) for t in tasks], dtype=jnp.int32)
    ref = jnp.broadcast_to(
        module.weight[ids][:, :, None, None],
        (len(tasks), channel, size[0], size[1]),
    )
    assert out.shape == (len(tasks), channel, size[0], size[1])
    assert out.dtype == module.weight.dtype
    assert jnp.allclose(out, ref), "Pallas output mismatch vs reference"

    print("KERNEL_OK")
</pallas_src>

<mosaic_0001>
module attributes {stable_mosaic.version = 11 : i64} {
  func.func @_task_prompt_kernel(%arg0: i32, %arg1: i32, %arg2: memref<2xi32, #tpu.memory_space<smem>>, %arg3: memref<8x4xf32, #tpu.memory_space<vmem>>, %arg4: memref<2x8x256xf32, #tpu.memory_space<vmem>>) attributes {dimension_semantics = [#tpu.dimension_semantics<parallel>, #tpu.dimension_semantics<parallel>], iteration_bounds = array<i64: 1, 1>, scalar_prefetch = 1 : i64, scratch_operands = 0 : i64, tpu.core_type = #tpu.core_type<tc>, window_params = [{pipeline_mode = #tpu.pipeline_mode<synchronous>, transform_indices = @transform_0, window_bounds = array<i64: 8, 4>}, {transform_indices = @transform_1, window_bounds = array<i64: 2, 8, 256>}]} {
    %c2_i32 = arith.constant 2 : i32
    %0 = arith.muli %arg0, %c2_i32 : i32
    %c0 = arith.constant 0 : index
    %c0_0 = arith.constant 0 : index
    %1 = vector.load %arg3[%c0, %c0_0] : memref<8x4xf32, #tpu.memory_space<vmem>>, vector<8x4xf32>
    %2 = tpu.iota {dimensions = array<i32: 1>} : vector<8x4xi32>
    %c0_i32 = arith.constant 0 : i32
    %3 = arith.addi %0, %c0_i32 : i32
    %4 = arith.index_cast %3 : i32 to index
    %5 = memref.load %arg2[%4] : memref<2xi32, #tpu.memory_space<smem>>
    %6 = vector.broadcast %5 : i32 to vector<8x4xi32>
    %7 = arith.cmpi eq, %2, %6 : vector<8x4xi32>
    %cst = arith.constant 0.000000e+00 : f32
    %8 = vector.broadcast %cst : f32 to vector<8x4xf32>
    %9 = arith.select %7, %1, %8 : vector<8x4xi1>, vector<8x4xf32>
    %cst_1 = arith.constant dense<0.000000e+00> : vector<8xf32>
    %10 = vector.multi_reduction <add>, %9, %cst_1 [1] : vector<8x4xf32> to vector<8xf32>
    %11 = vector.shape_cast %10 : vector<8xf32> to vector<8x1xf32>
    %12 = vector.shape_cast %11 : vector<8x1xf32> to vector<8x1xf32>
    %13 = vector.broadcast %12 : vector<8x1xf32> to vector<8x256xf32>
    %14 = arith.index_cast %c0_i32 : i32 to index
    %c0_2 = arith.constant 0 : index
    %c0_3 = arith.constant 0 : index
    %15 = vector.load %arg4[%14, %c0_2, %c0_3] : memref<2x8x256xf32, #tpu.memory_space<vmem>>, vector<1x8x256xf32>
    %16 = vector.shape_cast %15 : vector<1x8x256xf32> to vector<8x256xf32>
    %17 = vector.shape_cast %13 : vector<8x256xf32> to vector<1x8x256xf32>
    tpu.vector_store %arg4[%14, %c0_2, %c0_3], %17 {strides = array<i32>} : memref<2x8x256xf32, #tpu.memory_space<vmem>>, vector<1x8x256xf32>,
    %c1_i32 = arith.constant 1 : i32
    %18 = arith.addi %0, %c1_i32 : i32
    %19 = arith.index_cast %18 : i32 to index
    %20 = memref.load %arg2[%19] : memref<2xi32, #tpu.memory_space<smem>>
    %21 = vector.broadcast %20 : i32 to vector<8x4xi32>
    %22 = arith.cmpi eq, %2, %21 : vector<8x4xi32>
    %cst_4 = arith.constant 0.000000e+00 : f32
    %23 = vector.broadcast %cst_4 : f32 to vector<8x4xf32>
    %24 = arith.select %22, %1, %23 : vector<8x4xi1>, vector<8x4xf32>
    %cst_5 = arith.constant dense<0.000000e+00> : vector<8xf32>
    %25 = vector.multi_reduction <add>, %24, %cst_5 [1] : vector<8x4xf32> to vector<8xf32>
    %26 = vector.shape_cast %25 : vector<8xf32> to vector<8x1xf32>
    %27 = vector.shape_cast %26 : vector<8x1xf32> to vector<8x1xf32>
    %28 = vector.broadcast %27 : vector<8x1xf32> to vector<8x256xf32>
    %29 = arith.index_cast %c1_i32 : i32 to index
    %c0_6 = arith.constant 0 : index
    %c0_7 = arith.constant 0 : index
    %30 = vector.load %arg4[%29, %c0_6, %c0_7] : memref<2x8x256xf32, #tpu.memory_space<vmem>>, vector<1x8x256xf32>
    %31 = vector.shape_cast %30 : vector<1x8x256xf32> to vector<8x256xf32>
    %32 = vector.shape_cast %28 : vector<8x256xf32> to vector<1x8x256xf32>
    tpu.vector_store %arg4[%29, %c0_6, %c0_7], %32 {strides = array<i32>} : memref<2x8x256xf32, #tpu.memory_space<vmem>>, vector<1x8x256xf32>,
    %c2_i32_8 = arith.constant 2 : i32
    return
  }
  func.func @transform_0(%arg0: i32, %arg1: i32, %arg2: memref<2xi32, #tpu.memory_space<smem>>) -> (i32, i32) {
    %c0_i32 = arith.constant 0 : i32
    %c0_i32_0 = arith.constant 0 : i32
    %c0_i32_1 = arith.constant 0 : i32
    return %c0_i32, %c0_i32_0 : i32, i32
  }
  func.func @transform_1(%arg0: i32, %arg1: i32, %arg2: memref<2xi32, #tpu.memory_space<smem>>) -> (i32, i32, i32) {
    %c0_i32 = arith.constant 0 : i32
    %c0_i32_0 = arith.constant 0 : i32
    return %arg0, %c0_i32, %arg1 : i32, i32, i32
  }
}

</mosaic_0001>

<bundles_post_ra>
// kernel: tpu_custom_call.1
= control target key start
LH: loop header
LB: loop body
LE: loop exit
PB: predicated region body
PF: predicated region fallthrough
CT: control target
= control target key end

     0   :  { %s126_s0 = inlined_call_operand.vmem [shape: s32[2], index: 0, kind: input, shape index: {}]   ;;  %s127_s1 = inlined_call_operand.vmem [shape: f32[8,4], index: 1, kind: input, shape index: {}]   ;;  %s128_s2 = inlined_call_operand.hbm [shape: f32[2,8,256], index: 2, kind: output, shape index: {}]  }
   0x1   :  { %s7_s11 = sshll.u32 %s126_s0, 4  ;;  %s8_s11 = int_to_ptr.vmem [resolvable:$true] %s7_s11 }
   0x2   :  { %s62_s12 = scalar_lea.vmem %s8_s11, 16  ;;  %p67_p1 = scmp.lt.s32.totalorder %s8_s11, %s8_s11 }
   0x3   :  { %p63_p0 = scmp.ne.s32.totalorder %s8_s11, %s62_s12  ;;  %p68_p2 = scmp.lt.s32.totalorder %s62_s12, %s62_s12 }
   0x5   :  { %p69_p3 = por %p68_p2, %p67_p1 }
   0x7   :  { %p70_p4 = pnand %p69_p3, %p63_p0 }
   0x9   :  { %73 = shalt.err (!%p70_p4)  }
   0xa   :  { %s98_s13 = smov [#allocation3]  }
   0xb   :  { %10 = dma.vmem_to_smem %s8_s11, 16, %s98_s13, [#allocation2] }
   0xc   :  { %94 = dma.done.wait [#allocation2], 16 }
   0xd   :  { %95 = vsyncadd [#allocation2], 4294967280 }
   0xe   :  { %12 = sfence }
   0xf   :  { %v18_v0 = vlaneseq  ;;  %s20_s14 = sld [smem:[#allocation3]] }
  0x10   :  { %13 = vsyncpa [#allocation5], 0  ;;  %s57_s15 = sld [smem:[#allocation3 + $0x1]]  ;;  %v17_v2 = vld [vmem:[%s127_s1] sm:$0xff]  ;;  %vm24_vm0 = vcmask 31744   ;;  %s99_s17 = smov [#allocation4]  }
  0x11   :  { %v19_v1 = vand.u32 127, %v18_v0  ;;  %s46_s18 = sshll.u32 %s99_s17, 4  ;;  %s47_s18 = int_to_ptr.vmem [resolvable:$true] %s46_s18 }
  0x12   :  { %s74_s1 = scalar_lea.vmem %s47_s18, 512  ;;  %p79_p6 = scmp.lt.s32.totalorder %s47_s18, %s47_s18 }
  0x13   :  { %p75_p5 = scmp.ne.s32.totalorder %s47_s18, %s74_s1  ;;  %p80_p7 = scmp.lt.s32.totalorder %s74_s1, %s74_s1 }
  0x15   :  { %v21_v3 = vstv %s20_s14  ;;  %p81_p8 = por %p80_p7, %p79_p6 }
  0x16   :  { %vm22_vm1 = vcmp.eq.s32.totalorder %v19_v1, %v21_v3  ;;  %v32_v4 = vstv %s57_s15 }
  0x17   :  { %v23_v5 = vsel %vm22_vm1, %v17_v2, 0.0  ;;  %vm33_vm2 = vcmp.eq.s32.totalorder %v19_v1, %v32_v4  ;;  %p82_p9 = pnand %p81_p8, %p75_p5 }
  0x18   :  { %v25_v6 = vsel %vm24_vm0, %v23_v5, 0.0  ;;  %v34_v7 = vsel %vm33_vm2, %v17_v2, 0.0 }
  0x19   :  { %26 = vadd.xlane.f32.xlu0 %v25_v6  ;;  %v35_v8 = vsel %vm24_vm0, %v34_v7, 0.0 }
  0x1d   :  { %36 = vadd.xlane.f32.xlu0 %v35_v8 }
  0xa2   :  { %v27_v9 = vpop.xlane.xlu0 %26 }
  0xa3   :  { %28 = vst [vmem:[#allocation4] sm:$0xff] %v27_v9  ;;  %29 = vst [vmem:[#allocation4 + $0x8] sm:$0xff] %v27_v9 }
  0xa6   :  { %v37_v10 = vpop.xlane.xlu0 %36 }
  0xa7   :  { %39 = vst [vmem:[#allocation4 + $0x10] sm:$0xff] %v37_v10  ;;  %40 = vst [vmem:[#allocation4 + $0x18] sm:$0xff] %v37_v10 }
  0xa8   :  { %85 = shalt.err (!%p82_p9)
}
  0xa9   :  { %s100_s19 = smov 256   ;;  %s101_s20 = smov 16  }
  0xaa   :  { %52 = dma.vmem_to_hbm [thread:$0]  %s47_s18, 512, %s128_s2, [#allocation5], %s100_s19, %s100_s19, %s101_s20  }
  0xab   :  { %96 = dma.done.wait [#allocation5], 512  }
  0xac   :  { %97 = vsyncadd [#allocation5], 4294966784 }
  0xad   :  { %56 = vsyncpa [#allocation5], 1 }

</bundles_post_ra>
